<compile_context>
chip_gen: v7x
topology: tpu7x:2x2x1
jax: 0.10.0
libtpu: 0.0.40
codegen_flags: <defaults>
</compile_context>

<pallas_src>
import math

import jax
import jax.numpy as jnp
from jax.experimental import pallas as pl
from jax.experimental.pallas import tpu as pltpu

_LANE = 128
# Default batch tile (lanes per grid step). (3, 65536) f32 input block pads to
# 8 sublanes -> 2 MiB, output block 2 MiB; double-buffered total ~8 MiB, which
# fits the default scoped-VMEM limit on v5e (16 MiB), v6e (32 MiB) and v7x
# (32 MiB of 64 MiB physical). Tunable upward on v6e for more roofline.
_DEFAULT_TILE_N = 64 * 1024


def _round_up(a, b):
    return ((a + b - 1) // b) * b


def logistic_kernel(x_ref, w_ref, b_ref, o_ref):
    """Fused linear(F->1) + sigmoid, batch on the lane axis.

    x_ref: (F, TN) VMEM tile   -- batch is lane-dense
    w_ref: (F,)    SMEM        -- nn.Linear weight row (3 scalars)
    b_ref: (1,)    SMEM        -- nn.Linear bias
    o_ref: (1, TN) VMEM tile   -- lane-dense output row
    """
    f = x_ref.shape[0]
    # z = w0*x[0,:] + w1*x[1,:] + ... + b  : pure per-lane VPU MACs, no XLU.
    z = jnp.full(o_ref.shape, b_ref[0], dtype=jnp.float32)
    for i in range(f):  # static, F == 3
        z = z + w_ref[i] * x_ref[i : i + 1, :]
    # exp + reciprocal both go to the EUP slot; VALU stays free.
    o_ref[...] = jax.nn.sigmoid(z).astype(o_ref.dtype)


def logistic_net(x, weight, bias, *, tile_n=_DEFAULT_TILE_N):
    """x: (N, 3) f32, weight: (1, 3) f32, bias: (1,) f32 -> (N, 1) f32."""
    n, f = x.shape
    assert weight.shape == (1, f) and bias.shape == (1,)

    # Batch on lanes: feature-major (F, N), padded so every tile is full.
    tn = min(tile_n, _round_up(n, _LANE))        # tile is a multiple of 128
    n_pad = _round_up(n, tn)
    x_t = x.T                                    # (F, N)
    if n_pad != n:
        x_t = jnp.pad(x_t, ((0, 0), (0, n_pad - n)))

    grid = (pl.cdiv(n_pad, tn),)

    out_row = pl.pallas_call(
        logistic_kernel,
        out_shape=jax.ShapeDtypeStruct((1, n_pad), x.dtype),
        grid=grid,
        in_specs=[
            # Pipelined, double-buffered batch tiles of x.
            pl.BlockSpec((f, tn), lambda i: (0, i)),
            # 16 bytes of parameters -> SMEM, resident for the whole grid.
            pl.BlockSpec(memory_space=pltpu.MemorySpace.SMEM),
            pl.BlockSpec(memory_space=pltpu.MemorySpace.SMEM),
        ],
        out_specs=pl.BlockSpec((1, tn), lambda i: (0, i)),
        compiler_params=pltpu.CompilerParams(
            dimension_semantics=("parallel",),   # megacore sharding on v7x
        ),
    )(x_t, weight.reshape(f), bias)

    # Back to the PyTorch-equivalent (N, 1) shape; drop padded lanes.
    return out_row[0, :n].reshape(n, 1)


if __name__ == "__main__":
    key = jax.random.PRNGKey(0)
    kx, kw, kb = jax.random.split(key, 3)

    in_features = 3
    out_features = 1
    batch = 8

    # Deterministic parameter init mirroring nn.Linear's default
    # U(-1/sqrt(fan_in), 1/sqrt(fan_in)).
    bound = 1.0 / math.sqrt(in_features)
    weight = jax.random.uniform(
        kw, (out_features, in_features), jnp.float32, -bound, bound
    )
    bias = jax.random.uniform(kb, (out_features,), jnp.float32, -bound, bound)

    x = jax.random.normal(kx, (batch, in_features), jnp.float32)

    out = logistic_net(x, weight, bias)
    out = jax.block_until_ready(out)

    # Reference check in plain JAX (same math as the PyTorch forward).
    ref = jax.nn.sigmoid(x @ weight.T + bias)
    assert out.shape == (batch, out_features)
    assert jnp.allclose(out, ref, atol=1e-6, rtol=1e-6)

    print("KERNEL_OK")
</pallas_src>

<mosaic_0001>
module attributes {stable_mosaic.version = 11 : i64} {
  func.func @logistic_kernel(%arg0: i32, %arg1: memref<3x128xf32, #tpu.memory_space<vmem>>, %arg2: memref<3xf32, #tpu.memory_space<smem>>, %arg3: memref<1xf32, #tpu.memory_space<smem>>, %arg4: memref<1x128xf32, #tpu.memory_space<vmem>>) attributes {dimension_semantics = [#tpu.dimension_semantics<parallel>], iteration_bounds = array<i64: 1>, scalar_prefetch = 0 : i64, scratch_operands = 0 : i64, tpu.core_type = #tpu.core_type<tc>, window_params = [{transform_indices = @transform_0, window_bounds = array<i64: 3, 128>}, {transform_indices = @transform_1, window_bounds = array<i64: 3>}, {transform_indices = @transform_2, window_bounds = array<i64: 1>}, {transform_indices = @transform_3, window_bounds = array<i64: 1, 128>}]} {
    %c0 = arith.constant 0 : index
    %0 = memref.load %arg3[%c0] : memref<1xf32, #tpu.memory_space<smem>>
    %1 = vector.broadcast %0 : f32 to vector<1x128xf32>
    %c0_0 = arith.constant 0 : index
    %2 = memref.load %arg2[%c0_0] : memref<3xf32, #tpu.memory_space<smem>>
    %c0_1 = arith.constant 0 : index
    %c0_2 = arith.constant 0 : index
    %3 = vector.load %arg1[%c0_1, %c0_2] : memref<3x128xf32, #tpu.memory_space<vmem>>, vector<1x128xf32>
    %4 = vector.broadcast %2 : f32 to vector<1x128xf32>
    %5 = arith.mulf %4, %3 : vector<1x128xf32>
    %6 = arith.addf %1, %5 : vector<1x128xf32>
    %c1 = arith.constant 1 : index
    %7 = memref.load %arg2[%c1] : memref<3xf32, #tpu.memory_space<smem>>
    %c1_3 = arith.constant 1 : index
    %c0_4 = arith.constant 0 : index
    %8 = vector.load %arg1[%c1_3, %c0_4] : memref<3x128xf32, #tpu.memory_space<vmem>>, vector<1x128xf32>
    %9 = vector.broadcast %7 : f32 to vector<1x128xf32>
    %10 = arith.mulf %9, %8 : vector<1x128xf32>
    %11 = arith.addf %6, %10 : vector<1x128xf32>
    %c2 = arith.constant 2 : index
    %12 = memref.load %arg2[%c2] : memref<3xf32, #tpu.memory_space<smem>>
    %c2_5 = arith.constant 2 : index
    %c0_6 = arith.constant 0 : index
    %13 = vector.load %arg1[%c2_5, %c0_6] : memref<3x128xf32, #tpu.memory_space<vmem>>, vector<1x128xf32>
    %14 = vector.broadcast %12 : f32 to vector<1x128xf32>
    %15 = arith.mulf %14, %13 : vector<1x128xf32>
    %16 = arith.addf %11, %15 : vector<1x128xf32>
    %17 = arith.negf %16 : vector<1x128xf32>
    %18 = math.exp %17 : vector<1x128xf32>
    %cst = arith.constant 1.000000e+00 : f32
    %19 = vector.broadcast %cst : f32 to vector<1x128xf32>
    %20 = arith.addf %19, %18 : vector<1x128xf32>
    %21 = arith.divf %19, %20 : vector<1x128xf32>
    %c0_7 = arith.constant 0 : index
    %c0_8 = arith.constant 0 : index
    %22 = vector.load %arg4[%c0_7, %c0_8] : memref<1x128xf32, #tpu.memory_space<vmem>>, vector<1x128xf32>
    tpu.vector_store %arg4[%c0_7, %c0_8], %21 {strides = array<i32>} : memref<1x128xf32, #tpu.memory_space<vmem>>, vector<1x128xf32>,
    return
  }
  func.func @transform_0(%arg0: i32) -> (i32, i32) {
    %c0_i32 = arith.constant 0 : i32
    %c0_i32_0 = arith.constant 0 : i32
    return %c0_i32, %arg0 : i32, i32
  }
  func.func @transform_1(%arg0: i32) -> i32 {
    %c0_i32 = arith.constant 0 : i32
    %c0_i32_0 = arith.constant 0 : i32
    return %c0_i32 : i32
  }
  func.func @transform_2(%arg0: i32) -> i32 {
    %c0_i32 = arith.constant 0 : i32
    %c0_i32_0 = arith.constant 0 : i32
    return %c0_i32 : i32
  }
  func.func @transform_3(%arg0: i32) -> (i32, i32) {
    %c0_i32 = arith.constant 0 : i32
    %c0_i32_0 = arith.constant 0 : i32
    return %c0_i32, %arg0 : i32, i32
  }
}

</mosaic_0001>

<bundles_post_ra>
// kernel: tpu_custom_call.1
= control target key start
LH: loop header
LB: loop body
LE: loop exit
PB: predicated region body
PF: predicated region fallthrough
CT: control target
= control target key end

     0   :  { %9 = vsyncpa [#allocation4], 0  ;;  %s206_s0 = inlined_call_operand.hbm [shape: f32[3,128], index: 0, kind: input, shape index: {}]   ;;  %s207_s1 = inlined_call_operand.vmem [shape: f32[3], index: 1, kind: input, shape index: {}]   ;;  %s208_s2 = inlined_call_operand.<no memory space> [shape: f32[1], index: 2, kind: input, shape index: {}]   ;;  %s209_s3 = inlined_call_operand.hbm [shape: f32[1,128], index: 3, kind: output, shape index: {}]  }
   0x1   :  { %10 = vsyncpa [#allocation6], 0 }
   0x2   :  { %11 = vsyncpa [#allocation5], 0  ;;  %s28_s14 = sshll.u32 %s207_s1, 4  ;;  %s153_s15 = smov [#allocation3]   ;;  %s29_s14 = int_to_ptr.vmem [resolvable:$true] %s28_s14 }
   0x3   :  { %s18_s16 = sshll.u32 %s153_s15, 4  ;;  %s91_s19 = scalar_lea.hbm %s206_s0, 64  ;;  %s19_s16 = int_to_ptr.vmem [resolvable:$true] %s18_s16 }
   0x4   :  { %p92_p0 = scmp.ne.s32.totalorder %s206_s0, %s91_s19  ;;  %p95_p1 = scmp.lt.u32.totalorder %s91_s19, %s206_s0 }
   0x6   :  { %p97_p2 = pnand %p95_p1, %p92_p0 }
   0x8   :  { %100 = shalt.err (!%p97_p2)
}
   0x9   :  { %s101_s24 = scalar_lea.vmem %s19_s16, 64  ;;  %p106_p4 = scmp.lt.s32.totalorder %s19_s16, %s19_s16 }
   0xa   :  { %p102_p3 = scmp.ne.s32.totalorder %s19_s16, %s101_s24  ;;  %p107_p5 = scmp.lt.s32.totalorder %s101_s24, %s101_s24 }
   0xc   :  { %p108_p6 = por %p107_p5, %p106_p4 }
   0xe   :  { %p109_p7 = pnand %p108_p6, %p102_p3 }
  0x10   :  { %112 = shalt.err (!%p109_p7)
}
  0x11   :  { %21 = dma.hbm_to_vmem [thread:$0]  %s206_s0, 64, %s19_s16, [#allocation4]  }
  0x12   :  { %s113_s26 = scalar_lea.vmem %s29_s14, 16  ;;  %p118_p9 = scmp.lt.s32.totalorder %s29_s14, %s29_s14 }
  0x13   :  { %p114_p8 = scmp.ne.s32.totalorder %s29_s14, %s113_s26  ;;  %p119_p10 = scmp.lt.s32.totalorder %s113_s26, %s113_s26 }
  0x15   :  { %p120_p11 = por %p119_p10, %p118_p9 }
  0x17   :  { %p121_p12 = pnand %p120_p11, %p114_p8 }
  0x19   :  { %124 = shalt.err (!%p121_p12)
}
  0x1a   :  { %s154_s27 = smov [#allocation7]  }
  0x1b   :  { %31 = dma.vmem_to_smem %s29_s14, 16, %s154_s27, [#allocation6]  }
  0x1c   :  { %147 = dma.done.wait [#allocation4], 64  }
  0x1d   :  { %148 = vsyncadd [#allocation4], 4294967232 }
  0x1e   :  { %149 = dma.done.wait [#allocation6], 16  }
  0x1f   :  { %150 = vsyncadd [#allocation6], 4294967280 }
  0x20   :  { %40 = sfence }
  0x21   :  { %s43_s28 = sld [smem:[#allocation7]]  ;;  %s81_s29 = sld [smem:[#allocation7 + $0x1]]  ;;  %v44_v0 = vld [vmem:[#allocation3] sm:$0x1]  ;;  %v49_v1 = vld [vmem:[#allocation3 + $0x1] sm:$0x1]  ;;  %v42_v2 = vstv %s208_s2 }
  0x22   :  { %s82_s30 = sld [smem:[#allocation7 + $0x2]]  ;;  %v54_v5 = vld [vmem:[#allocation3 + $0x2] sm:$0x1]  ;;  %s155_s5 = smov [#allocation8]  }
  0x23   :  { %s71_s6 = sshll.u32 %s155_s5, 4  ;;  %s72_s6 = int_to_ptr.vmem [resolvable:$true] %s71_s6 }
  0x24   :  { %s125_s2 = scalar_lea.vmem %s72_s6, 16  ;;  %s129_s7 = scalar_lea.vmem %s72_s6, 32 }
  0x25   :  { %p126_p13 = scmp.ne.s32.totalorder %s72_s6, %s125_s2  ;;  %p130_p0 = scmp.lt.s32.totalorder %s72_s6, %s72_s6 }
  0x26   :  { %p131_p1 = scmp.lt.s32.totalorder %s129_s7, %s125_s2 }
  0x27   :  { %v45_v3 = vstv %s43_s28  ;;  %v50_v4 = vstv %s81_s29 }
  0x28   :  { %v46_v6 = vmul.f32 %v45_v3, %v44_v0  ;;  %v51_v7 = vmul.f32 %v50_v4, %v49_v1  ;;  %v55_v8 = vstv %s82_s30  ;;  %p132_p2 = por %p131_p1, %p130_p0 }
  0x29   :  { %v56_v10 = vmul.f32 %v55_v8, %v54_v5 }
  0x2a   :  { %v47_v9 = vadd.f32 %v46_v6, %v42_v2  ;;  %p133_p3 = pnand %p132_p2, %p126_p13 }
  0x2c   :  { %v52_v11 = vadd.f32 %v51_v7, %v47_v9 }
  0x2e   :  { %v57_v12 = vadd.f32 %v56_v10, %v52_v11 }
  0x30   :  { %v83_v13 = vmul.f32 -1.442695, %v57_v12 }
  0x32   :  { %87 = vpow2.f32 %v83_v13 }
  0x3c   :  { %v88_v14 = vpop.eup %87 }
  0x3d   :  { %v61_v15 = vadd.f32 1.0, %v88_v14 }
  0x3f   :  { %89 = vrcp.f32 %v61_v15 }
  0x49   :  { %v90_v16 = vpop.eup %89 }
  0x4a   :  { %64 = vst [vmem:[#allocation8] sm:$0x1] %v90_v16 }
  0x4b   :  { %136 = shalt.err (!%p133_p3)
}
  0x4c   :  { %s137_s10 = scalar_lea.hbm %s209_s3, 16 }
  0x4d   :  { %p138_p4 = scmp.ne.s32.totalorder %s209_s3, %s137_s10  ;;  %p141_p5 = scmp.lt.u32.totalorder %s137_s10, %s209_s3 }
  0x4f   :  { %p143_p6 = pnand %p141_p5, %p138_p4 }
  0x51   :  { %146 = shalt.err (!%p143_p6)
}
  0x52   :  { %74 = dma.vmem_to_hbm [thread:$0]  %s72_s6, 16, %s209_s3, [#allocation5]  }
  0x53   :  { %151 = dma.done.wait [#allocation5], 16  }
  0x54   :  { %152 = vsyncadd [#allocation5], 4294967280 }
  0x55   :  { %78 = vsyncpa [#allocation4], 1 }
  0x56   :  { %79 = vsyncpa [#allocation5], 1 }
  0x57   :  { %80 = vsyncpa [#allocation6], 1 }

</bundles_post_ra>
